<compile_context>
chip_gen: v7x
topology: tpu7x:2x2x1
jax: 0.10.0
libtpu: 0.0.40
codegen_flags: <defaults>
</compile_context>

<pallas_src>
import math

import jax
import jax.numpy as jnp
from jax.experimental import pallas as pl
from jax.experimental.pallas import tpu as pltpu

_LANES = 128          # lane-dense last dim (full vreg width)
_BLOCK_ROWS = 4096    # (4096, 128) f32 block = 2 MiB -> ~8 MiB double-buffered in+out


def _h264rgb_kernel(x_ref, o_ref):
    """Elementwise quantize->dequantize roundtrip (codec treated as identity)."""
    x = x_ref[...].astype(jnp.float32)
    clamped = jnp.clip(x, 0.0, 1.0)
    # (x.clamp(0,1) * 255).to(torch.uint8): truncation == floor (non-negative input).
    o_ref[...] = jnp.floor(clamped * 255.0) * (1.0 / 255.0)


def _run_kernel_2d(x2d):
    """x2d: (rows, 128) array of any float/int dtype -> (rows, 128) float32."""
    rows, lanes = x2d.shape
    block_rows = min(_BLOCK_ROWS, rows)   # == rows (full dim) for small inputs
    grid = (pl.cdiv(rows, block_rows),)
    n_elems = rows * lanes
    cost = pl.CostEstimate(
        flops=5 * n_elems,
        transcendentals=0,
        bytes_accessed=(x2d.dtype.itemsize + 4) * n_elems,  # read src + write f32
    )
    spec_in = pl.BlockSpec((block_rows, lanes), lambda i: (i, 0))
    spec_out = pl.BlockSpec((block_rows, lanes), lambda i: (i, 0))
    return pl.pallas_call(
        _h264rgb_kernel,
        out_shape=jax.ShapeDtypeStruct((rows, lanes), jnp.float32),
        grid_spec=pltpu.PrefetchScalarGridSpec(
            num_scalar_prefetch=0,
            grid=grid,
            in_specs=[spec_in],
            out_specs=spec_out,
        ),
        compiler_params=pltpu.CompilerParams(
            dimension_semantics=("parallel",)),
        cost_estimate=cost,
    )(x2d)


def _quantize_roundtrip_impl(frames):
    """Flatten to a lane-dense 2D view, run the kernel, restore the shape."""
    shape = frames.shape
    n = math.prod(shape)
    flat = frames.reshape(-1)
    n_pad = (-n) % _LANES
    if n_pad:
        # Only hit when total element count is not a multiple of 128.
        flat = jnp.pad(flat, (0, n_pad))
    rows = flat.shape[0] // _LANES
    out2d = _run_kernel_2d(flat.reshape(rows, _LANES))
    out = out2d.reshape(-1)
    if n_pad:
        out = out[:n]
    return out.reshape(shape)


# Straight-through estimator: forward value is exactly the dequantized frames,
# gradient wrt frames is identity — matching `frames + (decoded - frames).detach()`.
@jax.custom_vjp
def _quantize_roundtrip(frames):
    return _quantize_roundtrip_impl(frames)


def _qr_fwd(frames):
    return _quantize_roundtrip_impl(frames), None


def _qr_bwd(_, g):
    return (g,)


_quantize_roundtrip.defvjp(_qr_fwd, _qr_bwd)


class H264rgbPallas:
    """JAX/Pallas re-implementation of videoseal H264rgb forward semantics."""

    def __init__(self, min_crf=None, max_crf=None, fps=24):
        self.codec = "libx264rgb"
        self.pix_fmt = "rgb24"
        self.crf = 28
        self.fps = fps
        self.min_crf = min_crf
        self.max_crf = max_crf

    def get_random_crf(self, key):
        if self.min_crf is None or self.max_crf is None:
            raise ValueError("min_crf and max_crf must be provided")
        return int(jax.random.randint(key, (1,), self.min_crf, self.max_crf + 1)[0])

    def __call__(self, frames, mask=None, crf=None, key=None):
        crf = crf or self.get_random_crf(key)
        self.crf = crf  # only relevant to the (untranslatable) codec — see TODO above.

        # Pad to even H/W, matching F.pad(..., (0, W%2, 0, H%2), value=0).
        T, C, H, W = frames.shape
        pad_h, pad_w = H % 2, W % 2
        if pad_h != 0 or pad_w != 0:
            frames = jnp.pad(frames, ((0, 0), (0, 0), (0, pad_h), (0, pad_w)))
            if mask is not None:
                mh, mw = mask.shape[2] % 2, mask.shape[3] % 2
                mask = jnp.pad(mask, ((0, 0), (0, 0), (0, mh), (0, mw)))

        compressed = _quantize_roundtrip(frames)
        return compressed, mask


if __name__ == "__main__":
    key = jax.random.PRNGKey(0)
    k_frames, k_mask, k_crf = jax.random.split(key, 3)

    # Small video: T=2 frames, C=3 (RGB), H=W=16 — shapes consistent with (T, C, H, W).
    T, C, H, W = 2, 3, 16, 16
    frames = jax.random.uniform(k_frames, (T, C, H, W), dtype=jnp.float32)
    mask = (jax.random.uniform(k_mask, (T, 1, H, W)) > 0.5).astype(jnp.float32)

    aug = H264rgbPallas(min_crf=22, max_crf=34, fps=24)
    out, out_mask = aug(frames, mask=mask, key=k_crf)
    out = jax.block_until_ready(out)

    # Sanity check against the pure-JAX reference of the implemented semantics.
    ref = jnp.floor(jnp.clip(frames, 0.0, 1.0) * 255.0) / 255.0
    assert out.shape == frames.shape
    assert out.dtype == jnp.float32
    assert jnp.max(jnp.abs(out - ref)) == 0.0  # bit-exact: kernel writes decoded directly
    assert out_mask.shape == mask.shape

    # Straight-through gradient check: d(sum(out))/d(frames) == ones.
    g = jax.grad(lambda f: jnp.sum(_quantize_roundtrip(f)))(frames)
    assert jnp.max(jnp.abs(g - 1.0)) == 0.0

    print("KERNEL_OK")
</pallas_src>

<mosaic_0001>
module attributes {stable_mosaic.version = 11 : i64} {
  func.func @_h264rgb_kernel(%arg0: i32, %arg1: memref<12x128xf32, #tpu.memory_space<vmem>>, %arg2: memref<12x128xf32, #tpu.memory_space<vmem>>) attributes {dimension_semantics = [#tpu.dimension_semantics<parallel>], iteration_bounds = array<i64: 1>, scalar_prefetch = 0 : i64, scratch_operands = 0 : i64, tpu.core_type = #tpu.core_type<tc>, window_params = [{transform_indices = @transform_0, window_bounds = array<i64: 12, 128>}, {transform_indices = @transform_1, window_bounds = array<i64: 12, 128>}]} {
    %c0 = arith.constant 0 : index
    %c0_0 = arith.constant 0 : index
    %0 = vector.load %arg1[%c0, %c0_0] : memref<12x128xf32, #tpu.memory_space<vmem>>, vector<12x128xf32>
    %cst = arith.constant 0.000000e+00 : f32
    %cst_1 = arith.constant 1.000000e+00 : f32
    %1 = vector.broadcast %cst : f32 to vector<12x128xf32>
    %2 = arith.maximumf %1, %0 : vector<12x128xf32>
    %3 = vector.broadcast %cst_1 : f32 to vector<12x128xf32>
    %4 = arith.minimumf %3, %2 : vector<12x128xf32>
    %cst_2 = arith.constant 2.550000e+02 : f32
    %5 = vector.broadcast %cst_2 : f32 to vector<12x128xf32>
    %6 = arith.mulf %4, %5 : vector<12x128xf32>
    %7 = math.floor %6 : vector<12x128xf32>
    %cst_3 = arith.constant 0.00392156886 : f32
    %8 = vector.broadcast %cst_3 : f32 to vector<12x128xf32>
    %9 = arith.mulf %7, %8 : vector<12x128xf32>
    %c0_4 = arith.constant 0 : index
    %c0_5 = arith.constant 0 : index
    %10 = vector.load %arg2[%c0_4, %c0_5] : memref<12x128xf32, #tpu.memory_space<vmem>>, vector<12x128xf32>
    tpu.vector_store %arg2[%c0_4, %c0_5], %9 {strides = array<i32>} : memref<12x128xf32, #tpu.memory_space<vmem>>, vector<12x128xf32>,
    return
  }
  func.func @transform_0(%arg0: i32) -> (i32, i32) {
    %c0_i32 = arith.constant 0 : i32
    %c0_i32_0 = arith.constant 0 : i32
    return %arg0, %c0_i32 : i32, i32
  }
  func.func @transform_1(%arg0: i32) -> (i32, i32) {
    %c0_i32 = arith.constant 0 : i32
    %c0_i32_0 = arith.constant 0 : i32
    return %arg0, %c0_i32 : i32, i32
  }
}

</mosaic_0001>

<bundles_post_ra>
// kernel: tpu_custom_call.1
= control target key start
LH: loop header
LB: loop body
LE: loop exit
PB: predicated region body
PF: predicated region fallthrough
CT: control target
= control target key end

     0   :  { %6 = vsyncpa [#allocation3], 0  ;;  %s150_s0 = inlined_call_operand.hbm [shape: f32[12,128], index: 0, kind: input, shape index: {}]   ;;  %s151_s1 = inlined_call_operand.hbm [shape: f32[12,128], index: 1, kind: output, shape index: {}]  }
   0x1   :  { %7 = vsyncpa [#allocation4], 0  ;;  %s106_s6 = smov [#allocation2]   ;;  %s58_s10 = scalar_lea.hbm %s150_s0, 256 }
   0x2   :  { %s13_s7 = sshll.u32 %s106_s6, 4  ;;  %p59_p0 = scmp.ne.s32.totalorder %s150_s0, %s58_s10  ;;  %s14_s7 = int_to_ptr.vmem [resolvable:$true] %s13_s7 }
   0x3   :  { %p62_p1 = scmp.lt.u32.totalorder %s58_s10, %s150_s0 }
   0x5   :  { %p64_p2 = pnand %p62_p1, %p59_p0 }
   0x7   :  { %67 = shalt.err (!%p64_p2)
}
   0x8   :  { %s68_s15 = scalar_lea.vmem %s14_s7, 256  ;;  %p73_p4 = scmp.lt.s32.totalorder %s14_s7, %s14_s7 }
   0x9   :  { %p69_p3 = scmp.ne.s32.totalorder %s14_s7, %s68_s15  ;;  %p74_p5 = scmp.lt.s32.totalorder %s68_s15, %s68_s15 }
   0xb   :  { %p75_p6 = por %p74_p5, %p73_p4 }
   0xd   :  { %p76_p7 = pnand %p75_p6, %p69_p3 }
   0xf   :  { %79 = shalt.err (!%p76_p7)
}
  0x10   :  { %s107_s16 = smov 128   ;;  %s108_s17 = smov 8  }
  0x11   :  { %19 = dma.hbm_to_vmem [thread:$0]  %s150_s0, 256, %s14_s7, [#allocation3], %s107_s16, %s107_s16, %s108_s17  }
  0x12   :  { %102 = dma.done.wait [#allocation3], 256  }
  0x13   :  { %103 = vsyncadd [#allocation3], 4294967040  ;;  %v23_v0 = vld [vmem:[#allocation2] sm:$0xff]  ;;  %v24_v1 = vld [vmem:[#allocation2 + $0x8] sm:$0xf]  ;;  %s109_s20 = smov [#allocation5]  }
  0x14   :  { %v25_v2 = vmax.f32 %v23_v0, 0.0  ;;  %v26_v3 = vmax.f32 %v24_v1, 0.0  ;;  %s42_s21 = sshll.u32 %s109_s20, 4  ;;  %s43_s21 = int_to_ptr.vmem [resolvable:$true] %s42_s21 }
  0x15   :  { %s80_s0 = scalar_lea.vmem %s43_s21, 256  ;;  %p85_p9 = scmp.lt.s32.totalorder %s43_s21, %s43_s21 }
  0x16   :  { %v27_v4 = vmin.f32 %v25_v2, 1.0  ;;  %v28_v5 = vmin.f32 %v26_v3, 1.0  ;;  %p81_p8 = scmp.ne.s32.totalorder %s43_s21, %s80_s0  ;;  %p86_p10 = scmp.lt.s32.totalorder %s80_s0, %s80_s0 }
  0x18   :  { %v29_v6 = vmul.f32 255.0, %v27_v4  ;;  %v30_v7 = vmul.f32 255.0, %v28_v5  ;;  %p87_p11 = por %p86_p10, %p85_p9 }
  0x1a   :  { %v31_v8 = vfloor.f32 %v29_v6  ;;  %v32_v9 = vfloor.f32 %v30_v7  ;;  %p88_p12 = pnand %p87_p11, %p81_p8 }
  0x1c   :  { %v33_v10 = vmul.f32 0.003921569, %v31_v8  ;;  %v34_v11 = vmul.f32 0.003921569, %v32_v9 }
  0x1e   :  { %35 = vst [vmem:[#allocation5] sm:$0xff] %v33_v10  ;;  %36 = vst [vmem:[#allocation5 + $0x8] sm:$0xf] %v34_v11 }
  0x1f   :  { %91 = shalt.err (!%p88_p12)
}
  0x20   :  { %s92_s24 = scalar_lea.hbm %s151_s1, 256 }
  0x21   :  { %p93_p13 = scmp.ne.s32.totalorder %s151_s1, %s92_s24  ;;  %p96_p0 = scmp.lt.u32.totalorder %s92_s24, %s151_s1 }
  0x23   :  { %p98_p1 = pnand %p96_p0, %p93_p13 }
  0x25   :  { %101 = shalt.err (!%p98_p1)
}
  0x26   :  { %48 = dma.vmem_to_hbm [thread:$0]  %s43_s21, 256, %s151_s1, [#allocation4], %s107_s16, %s107_s16, %s108_s17  }
  0x27   :  { %104 = dma.done.wait [#allocation4], 256  }
  0x28   :  { %105 = vsyncadd [#allocation4], 4294967040 }
  0x29   :  { %52 = vsyncpa [#allocation3], 1 }
  0x2a   :  { %53 = vsyncpa [#allocation4], 1 }

</bundles_post_ra>
